<compile_context>
chip_gen: v7x
topology: tpu7x:2x2x1
jax: 0.10.0
libtpu: 0.0.40
codegen_flags: <defaults>
</compile_context>

<pallas_src>
import jax
import jax.numpy as jnp
from jax.experimental import pallas as pl
from jax.experimental.pallas import tpu as pltpu


def _round_up(x, m):
    return (x + m - 1) // m * m


def _embedding_kernel(x_ref, w1_ref, b1_ref, w2_ref, b2_ref, o_ref, h_ref):
    # Layer 1 runs once per M tile (e == 0); result cached in bf16 VMEM scratch.
    @pl.when(pl.program_id(1) == 0)
    def _():
        h = jnp.dot(x_ref[...], w1_ref[...], preferred_element_type=jnp.float32)
        h = jnp.maximum(h + b1_ref[...], 0.0)           # bias + ReLU in f32
        h_ref[...] = h.astype(h_ref.dtype)

    # Layer 2: bf16 operands, f32 MXU accumulation; store the final dtype.
    out = jnp.dot(h_ref[...], w2_ref[...], preferred_element_type=jnp.float32)
    o_ref[...] = (out + b2_ref[...]).astype(o_ref.dtype)


def triplet_net_forward(x1, x2, x3, w1, b1, w2, b2):
    """TripletNet.forward: shared embedding net applied to x1, x2, x3."""
    assert x1.shape == x2.shape == x3.shape
    B, D_in = x1.shape
    H = w1.shape[1]
    E = w2.shape[1]
    out_dtype = x1.dtype

    M = 3 * B  # branch axis folded into the batch

    # ---- Lane-dense / sublane-aligned padded shapes ----
    D_pad = _round_up(D_in, 128)
    H_pad = _round_up(H, 128)
    E_pad = _round_up(E, 128)

    # M tile: multiple of 16 (bf16 packing); >=2 grid steps for moderate M so
    # both v7x TensorCores get work; 512-row tiles once M is large.
    if M <= 16:
        tm = 16
    elif M <= 1024:
        tm = _round_up((M + 1) // 2, 16)
    else:
        tm = 512
    M_pad = _round_up(M, tm)
    n_m = M_pad // tm

    # E tile: whole-E when small, otherwise 256-wide lane tiles.
    tn = E_pad if E_pad <= 512 else 256
    n_e = E_pad // tn
    # TODO(synk): add K (D/H) grid tiling with an f32 accumulator + pl.when
    #             init/finalize once W1 itself no longer fits in VMEM.

    # ---- Padded operands (zero padding is exact for this MLP) ----
    # One bf16 slab, written in place: no concatenate / extra cast passes.
    x_p = jnp.zeros((M_pad, D_pad), jnp.bfloat16)
    x_p = x_p.at[0 * B:1 * B, :D_in].set(x1.astype(jnp.bfloat16))
    x_p = x_p.at[1 * B:2 * B, :D_in].set(x2.astype(jnp.bfloat16))
    x_p = x_p.at[2 * B:3 * B, :D_in].set(x3.astype(jnp.bfloat16))

    w1_p = jnp.zeros((D_pad, H_pad), jnp.bfloat16).at[:D_in, :H].set(
        w1.astype(jnp.bfloat16))
    w2_p = jnp.zeros((H_pad, E_pad), jnp.bfloat16).at[:H, :E].set(
        w2.astype(jnp.bfloat16))
    b1_p = jnp.zeros((1, H_pad), jnp.float32).at[0, :H].set(
        b1.astype(jnp.float32))
    b2_p = jnp.zeros((1, E_pad), jnp.float32).at[0, :E].set(
        b2.astype(jnp.float32))

    out_bytes = jnp.dtype(out_dtype).itemsize

    def _vmem_limit(single_buffer):
        nw = 1 if single_buffer else 2
        nw2 = nw if n_e == 1 else 2            # W2/b2 stream when E is tiled
        fp = (2 * tm * D_pad * 2               # x tile (double-buffered bf16)
              + nw * D_pad * H_pad * 2         # W1
              + nw * H_pad * 4                 # b1 (f32)
              + nw2 * H_pad * tn * 2           # W2
              + nw2 * tn * 4                   # b2 (f32)
              + 2 * tm * tn * out_bytes        # output tile
              + tm * H_pad * 2                 # h scratch (bf16)
              + tm * H_pad * 4)                # layer-1 f32 accumulator
        return min(2 * fp + (4 << 20), 64 * 1024 * 1024)

    def _run(single_buffer_weights):
        const_mode = ({"pipeline_mode": pl.Buffered(1)}
                      if single_buffer_weights else {})
        w2_mode = const_mode if n_e == 1 else {}
        grid_spec = pltpu.PrefetchScalarGridSpec(
            num_scalar_prefetch=0,
            grid=(n_m, n_e),
            in_specs=[
                pl.BlockSpec((tm, D_pad), lambda i, j: (i, 0)),       # x tile
                pl.BlockSpec((D_pad, H_pad), lambda i, j: (0, 0),
                             **const_mode),                           # W1
                pl.BlockSpec((1, H_pad), lambda i, j: (0, 0),
                             **const_mode),                           # b1
                pl.BlockSpec((H_pad, tn), lambda i, j: (0, j),
                             **w2_mode),                              # W2
                pl.BlockSpec((1, tn), lambda i, j: (0, j),
                             **w2_mode),                              # b2
            ],
            out_specs=pl.BlockSpec((tm, tn), lambda i, j: (i, j)),
            scratch_shapes=[pltpu.VMEM((tm, H_pad), jnp.bfloat16)],   # h cache
        )
        return pl.pallas_call(
            _embedding_kernel,
            out_shape=jax.ShapeDtypeStruct((M_pad, E_pad), out_dtype),
            grid_spec=grid_spec,
            compiler_params=pltpu.CompilerParams(
                dimension_semantics=("parallel", "arbitrary"),
                vmem_limit_bytes=_vmem_limit(single_buffer_weights)),
        )(x_p, w1_p, b1_p, w2_p, b2_p)

    try:
        out = _run(True)
    except Exception:
        # Fallback for jax builds that reject Buffered(1) single-buffering.
        out = _run(False)

    out = out[:M, :E]                    # strip padding; already final dtype
    return out[:B], out[B:2 * B], out[2 * B:]


def _reference(x1, x2, x3, w1, b1, w2, b2):
    """Pure-JAX reference mimicking the kernel's bf16 operand rounding."""
    w1b = w1.astype(jnp.bfloat16).astype(jnp.float32)
    w2b = w2.astype(jnp.bfloat16).astype(jnp.float32)

    def emb(x):
        xb = x.astype(jnp.bfloat16).astype(jnp.float32)
        h = jnp.maximum(xb @ w1b + b1, 0.0)
        hb = h.astype(jnp.bfloat16).astype(jnp.float32)
        return hb @ w2b + b2

    return emb(x1), emb(x2), emb(x3)


if __name__ == "__main__":
    key = jax.random.PRNGKey(0)
    kx1, kx2, kx3, kw1, kb1, kw2, kb2 = jax.random.split(key, 7)

    B, D_in, H, E = 8, 32, 64, 16  # small shapes

    x1 = jax.random.normal(kx1, (B, D_in), dtype=jnp.float32)
    x2 = jax.random.normal(kx2, (B, D_in), dtype=jnp.float32)
    x3 = jax.random.normal(kx3, (B, D_in), dtype=jnp.float32)

    # Deterministic parameter init for the embedding net stand-in.
    w1 = jax.random.normal(kw1, (D_in, H), dtype=jnp.float32) * 0.1
    b1 = jax.random.normal(kb1, (H,), dtype=jnp.float32) * 0.1
    w2 = jax.random.normal(kw2, (H, E), dtype=jnp.float32) * 0.1
    b2 = jax.random.normal(kb2, (E,), dtype=jnp.float32) * 0.1

    o1, o2, o3 = triplet_net_forward(x1, x2, x3, w1, b1, w2, b2)
    jax.block_until_ready((o1, o2, o3))

    r1, r2, r3 = _reference(x1, x2, x3, w1, b1, w2, b2)
    assert o1.shape == (B, E) and o2.shape == (B, E) and o3.shape == (B, E)
    assert o1.dtype == x1.dtype
    assert jnp.allclose(o1, r1, atol=1e-2, rtol=1e-2), "branch 1 mismatch"
    assert jnp.allclose(o2, r2, atol=1e-2, rtol=1e-2), "branch 2 mismatch"
    assert jnp.allclose(o3, r3, atol=1e-2, rtol=1e-2), "branch 3 mismatch"

    print("KERNEL_OK")
</pallas_src>

<mosaic_0001>
module attributes {stable_mosaic.version = 11 : i64} {
  func.func @_embedding_kernel(%arg0: i32, %arg1: i32, %arg2: memref<16x128xbf16, #tpu.memory_space<vmem>>, %arg3: memref<128x128xbf16, #tpu.memory_space<vmem>>, %arg4: memref<1x128xf32, #tpu.memory_space<vmem>>, %arg5: memref<128x128xbf16, #tpu.memory_space<vmem>>, %arg6: memref<1x128xf32, #tpu.memory_space<vmem>>, %arg7: memref<16x128xf32, #tpu.memory_space<vmem>>, %arg8: memref<16x128xbf16, #tpu.memory_space<vmem>>) attributes {dimension_semantics = [#tpu.dimension_semantics<parallel>, #tpu.dimension_semantics<arbitrary>], iteration_bounds = array<i64: 2, 1>, scalar_prefetch = 0 : i64, scratch_operands = 1 : i64, tpu.core_type = #tpu.core_type<tc>, window_params = [{transform_indices = @transform_0, window_bounds = array<i64: 16, 128>}, {pipeline_mode = #tpu.pipeline_mode<synchronous>, transform_indices = @transform_1, window_bounds = array<i64: 128, 128>}, {pipeline_mode = #tpu.pipeline_mode<synchronous>, transform_indices = @transform_2, window_bounds = array<i64: 1, 128>}, {pipeline_mode = #tpu.pipeline_mode<synchronous>, transform_indices = @transform_3, window_bounds = array<i64: 128, 128>}, {pipeline_mode = #tpu.pipeline_mode<synchronous>, transform_indices = @transform_4, window_bounds = array<i64: 1, 128>}, {transform_indices = @transform_5, window_bounds = array<i64: 16, 128>}]} {
    %c0_i32 = arith.constant 0 : i32
    %0 = arith.cmpi eq, %arg1, %c0_i32 : i32
    %1 = arith.extui %0 : i1 to i32
    %c0_i32_0 = arith.constant 0 : i32
    %2 = arith.cmpi ne, %1, %c0_i32_0 : i32
    scf.if %2 {
      %c0_8 = arith.constant 0 : index
      %c0_9 = arith.constant 0 : index
      %10 = vector.load %arg2[%c0_8, %c0_9] : memref<16x128xbf16, #tpu.memory_space<vmem>>, vector<16x128xbf16>
      %c0_10 = arith.constant 0 : index
      %c0_11 = arith.constant 0 : index
      %11 = vector.load %arg3[%c0_10, %c0_11] : memref<128x128xbf16, #tpu.memory_space<vmem>>, vector<128x128xbf16>
      %cst_12 = arith.constant dense<0.000000e+00> : vector<16x128xf32>
      %12 = tpu.matmul %10, %11, %cst_12 {dimension_numbers = #tpu.dot_dimension_numbers<[1], [0], [0], [1], [0, 0, 1, 1], [], []>} : vector<16x128xbf16>, vector<128x128xbf16>, vector<16x128xf32> -> vector<16x128xf32>
      %c0_13 = arith.constant 0 : index
      %c0_14 = arith.constant 0 : index
      %13 = vector.load %arg4[%c0_13, %c0_14] : memref<1x128xf32, #tpu.memory_space<vmem>>, vector<1x128xf32>
      %14 = vector.broadcast %13 : vector<1x128xf32> to vector<16x128xf32>
      %15 = arith.addf %12, %14 : vector<16x128xf32>
      %cst_15 = arith.constant 0.000000e+00 : f32
      %16 = vector.broadcast %cst_15 : f32 to vector<16x128xf32>
      %17 = arith.maximumf %15, %16 : vector<16x128xf32>
      %18 = arith.truncf %17 : vector<16x128xf32> to vector<16x128xbf16>
      %c0_16 = arith.constant 0 : index
      %c0_17 = arith.constant 0 : index
      %19 = vector.load %arg8[%c0_16, %c0_17] : memref<16x128xbf16, #tpu.memory_space<vmem>>, vector<16x128xbf16>
      tpu.vector_store %arg8[%c0_16, %c0_17], %18 {strides = array<i32>} : memref<16x128xbf16, #tpu.memory_space<vmem>>, vector<16x128xbf16>,
    } else {
    }
    %c0 = arith.constant 0 : index
    %c0_1 = arith.constant 0 : index
    %3 = vector.load %arg8[%c0, %c0_1] : memref<16x128xbf16, #tpu.memory_space<vmem>>, vector<16x128xbf16>
    %c0_2 = arith.constant 0 : index
    %c0_3 = arith.constant 0 : index
    %4 = vector.load %arg5[%c0_2, %c0_3] : memref<128x128xbf16, #tpu.memory_space<vmem>>, vector<128x128xbf16>
    %cst = arith.constant dense<0.000000e+00> : vector<16x128xf32>
    %5 = tpu.matmul %3, %4, %cst {dimension_numbers = #tpu.dot_dimension_numbers<[1], [0], [0], [1], [0, 0, 1, 1], [], []>} : vector<16x128xbf16>, vector<128x128xbf16>, vector<16x128xf32> -> vector<16x128xf32>
    %c0_4 = arith.constant 0 : index
    %c0_5 = arith.constant 0 : index
    %6 = vector.load %arg6[%c0_4, %c0_5] : memref<1x128xf32, #tpu.memory_space<vmem>>, vector<1x128xf32>
    %7 = vector.broadcast %6 : vector<1x128xf32> to vector<16x128xf32>
    %8 = arith.addf %5, %7 : vector<16x128xf32>
    %c0_6 = arith.constant 0 : index
    %c0_7 = arith.constant 0 : index
    %9 = vector.load %arg7[%c0_6, %c0_7] : memref<16x128xf32, #tpu.memory_space<vmem>>, vector<16x128xf32>
    tpu.vector_store %arg7[%c0_6, %c0_7], %8 {strides = array<i32>} : memref<16x128xf32, #tpu.memory_space<vmem>>, vector<16x128xf32>,
    return
  }
  func.func @transform_0(%arg0: i32, %arg1: i32) -> (i32, i32) {
    %c0_i32 = arith.constant 0 : i32
    %c0_i32_0 = arith.constant 0 : i32
    return %arg0, %c0_i32 : i32, i32
  }
  func.func @transform_1(%arg0: i32, %arg1: i32) -> (i32, i32) {
    %c0_i32 = arith.constant 0 : i32
    %c0_i32_0 = arith.constant 0 : i32
    %c0_i32_1 = arith.constant 0 : i32
    return %c0_i32, %c0_i32_0 : i32, i32
  }
  func.func @transform_2(%arg0: i32, %arg1: i32) -> (i32, i32) {
    %c0_i32 = arith.constant 0 : i32
    %c0_i32_0 = arith.constant 0 : i32
    %c0_i32_1 = arith.constant 0 : i32
    return %c0_i32, %c0_i32_0 : i32, i32
  }
  func.func @transform_3(%arg0: i32, %arg1: i32) -> (i32, i32) {
    %c0_i32 = arith.constant 0 : i32
    %c0_i32_0 = arith.constant 0 : i32
    return %c0_i32, %arg1 : i32, i32
  }
  func.func @transform_4(%arg0: i32, %arg1: i32) -> (i32, i32) {
    %c0_i32 = arith.constant 0 : i32
    %c0_i32_0 = arith.constant 0 : i32
    return %c0_i32, %arg1 : i32, i32
  }
  func.func @transform_5(%arg0: i32, %arg1: i32) -> (i32, i32) {
    %c0_i32 = arith.constant 0 : i32
    return %arg0, %arg1 : i32, i32
  }
}

module attributes {stable_mosaic.version = 11 : i64} {
  func.func @_embedding_kernel(%arg0: i32, %arg1: i32, %arg2: memref<16x128xbf16, #tpu.memory_space<vmem>>, %arg3: memref<128x128xbf16, #tpu.memory_space<vmem>>, %arg4: memref<1x128xf32, #tpu.memory_space<vmem>>, %arg5: memref<128x128xbf16, #tpu.memory_space<vmem>>, %arg6: memref<1x128xf32, #tpu.memory_space<vmem>>, %arg7: memref<16x128xf32, #tpu.memory_space<vmem>>, %arg8: memref<16x128xbf16, #tpu.memory_space<vmem>>) attributes {dimension_semantics = [#tpu.dimension_semantics<parallel>, #tpu.dimension_semantics<arbitrary>], iteration_bounds = array<i64: 2, 1>, scalar_prefetch = 0 : i64, scratch_operands = 1 : i64, tpu.core_type = #tpu.core_type<tc>, window_params = [{transform_indices = @transform_0, window_bounds = array<i64: 16, 128>}, {pipeline_mode = #tpu.pipeline_mode<synchronous>, transform_indices = @transform_1, window_bounds = array<i64: 128, 128>}, {pipeline_mode = #tpu.pipeline_mode<synchronous>, transform_indices = @transform_2, window_bounds = array<i64: 1, 128>}, {transform_indices = @transform_3, window_bounds = array<i64: 128, 128>}, {transform_indices = @transform_4, window_bounds = array<i64: 1, 128>}, {transform_indices = @transform_5, window_bounds = array<i64: 16, 128>}]} {
    %c0_i32 = arith.constant 0 : i32
    %0 = arith.cmpi eq, %arg1, %c0_i32 : i32
    %1 = arith.extui %0 : i1 to i32
    %c0_i32_0 = arith.constant 0 : i32
    %2 = arith.cmpi ne, %1, %c0_i32_0 : i32
    scf.if %2 {
      %c0_8 = arith.constant 0 : index
      %c0_9 = arith.constant 0 : index
      %10 = vector.load %arg2[%c0_8, %c0_9] : memref<16x128xbf16, #tpu.memory_space<vmem>>, vector<16x128xbf16>
      %c0_10 = arith.constant 0 : index
      %c0_11 = arith.constant 0 : index
      %11 = vector.load %arg3[%c0_10, %c0_11] : memref<128x128xbf16, #tpu.memory_space<vmem>>, vector<128x128xbf16>
      %cst_12 = arith.constant dense<0.000000e+00> : vector<16x128xf32>
      %12 = tpu.matmul %10, %11, %cst_12 {dimension_numbers = #tpu.dot_dimension_numbers<[1], [0], [0], [1], [0, 0, 1, 1], [], []>} : vector<16x128xbf16>, vector<128x128xbf16>, vector<16x128xf32> -> vector<16x128xf32>
      %c0_13 = arith.constant 0 : index
      %c0_14 = arith.constant 0 : index
      %13 = vector.load %arg4[%c0_13, %c0_14] : memref<1x128xf32, #tpu.memory_space<vmem>>, vector<1x128xf32>
      %14 = vector.broadcast %13 : vector<1x128xf32> to vector<16x128xf32>
      %15 = arith.addf %12, %14 : vector<16x128xf32>
      %cst_15 = arith.constant 0.000000e+00 : f32
      %16 = vector.broadcast %cst_15 : f32 to vector<16x128xf32>
      %17 = arith.maximumf %15, %16 : vector<16x128xf32>
      %18 = arith.truncf %17 : vector<16x128xf32> to vector<16x128xbf16>
      %c0_16 = arith.constant 0 : index
      %c0_17 = arith.constant 0 : index
      %19 = vector.load %arg8[%c0_16, %c0_17] : memref<16x128xbf16, #tpu.memory_space<vmem>>, vector<16x128xbf16>
      tpu.vector_store %arg8[%c0_16, %c0_17], %18 {strides = array<i32>} : memref<16x128xbf16, #tpu.memory_space<vmem>>, vector<16x128xbf16>,
    } else {
    }
    %c0 = arith.constant 0 : index
    %c0_1 = arith.constant 0 : index
    %3 = vector.load %arg8[%c0, %c0_1] : memref<16x128xbf16, #tpu.memory_space<vmem>>, vector<16x128xbf16>
    %c0_2 = arith.constant 0 : index
    %c0_3 = arith.constant 0 : index
    %4 = vector.load %arg5[%c0_2, %c0_3] : memref<128x128xbf16, #tpu.memory_space<vmem>>, vector<128x128xbf16>
    %cst = arith.constant dense<0.000000e+00> : vector<16x128xf32>
    %5 = tpu.matmul %3, %4, %cst {dimension_numbers = #tpu.dot_dimension_numbers<[1], [0], [0], [1], [0, 0, 1, 1], [], []>} : vector<16x128xbf16>, vector<128x128xbf16>, vector<16x128xf32> -> vector<16x128xf32>
    %c0_4 = arith.constant 0 : index
    %c0_5 = arith.constant 0 : index
    %6 = vector.load %arg6[%c0_4, %c0_5] : memref<1x128xf32, #tpu.memory_space<vmem>>, vector<1x128xf32>
    %7 = vector.broadcast %6 : vector<1x128xf32> to vector<16x128xf32>
    %8 = arith.addf %5, %7 : vector<16x128xf32>
    %c0_6 = arith.constant 0 : index
    %c0_7 = arith.constant 0 : index
    %9 = vector.load %arg7[%c0_6, %c0_7] : memref<16x128xf32, #tpu.memory_space<vmem>>, vector<16x128xf32>
    tpu.vector_store %arg7[%c0_6, %c0_7], %8 {strides = array<i32>} : memref<16x128xf32, #tpu.memory_space<vmem>>, vector<16x128xf32>,
    return
  }
  func.func @transform_0(%arg0: i32, %arg1: i32) -> (i32, i32) {
    %c0_i32 = arith.constant 0 : i32
    %c0_i32_0 = arith.constant 0 : i32
    return %arg0, %c0_i32 : i32, i32
  }
  func.func @transform_1(%arg0: i32, %arg1: i32) -> (i32, i32) {
    %c0_i32 = arith.constant 0 : i32
    %c0_i32_0 = arith.constant 0 : i32
    %c0_i32_1 = arith.constant 0 : i32
    return %c0_i32, %c0_i32_0 : i32, i32
  }
  func.func @transform_2(%arg0: i32, %arg1: i32) -> (i32, i32) {
    %c0_i32 = arith.constant 0 : i32
    %c0_i32_0 = arith.constant 0 : i32
    %c0_i32_1 = arith.constant 0 : i32
    return %c0_i32, %c0_i32_0 : i32, i32
  }
  func.func @transform_3(%arg0: i32, %arg1: i32) -> (i32, i32) {
    %c0_i32 = arith.constant 0 : i32
    %c0_i32_0 = arith.constant 0 : i32
    return %c0_i32, %arg1 : i32, i32
  }
  func.func @transform_4(%arg0: i32, %arg1: i32) -> (i32, i32) {
    %c0_i32 = arith.constant 0 : i32
    %c0_i32_0 = arith.constant 0 : i32
    return %c0_i32, %arg1 : i32, i32
  }
  func.func @transform_5(%arg0: i32, %arg1: i32) -> (i32, i32) {
    %c0_i32 = arith.constant 0 : i32
    return %arg0, %arg1 : i32, i32
  }
}

</mosaic_0001>

<bundles_post_ra>
// kernel: tpu_custom_call.1
= control target key start
LH: loop header
LB: loop body
LE: loop exit
PB: predicated region body
PF: predicated region fallthrough
CT: control target
= control target key end

     0   :  { %10 = vsyncpa [#allocation4], 0  ;;  %s1377_s0 = inlined_call_operand.hbm [shape: bf16[32,128], index: 0, kind: input, shape index: {}]   ;;  %s1378_s1 = inlined_call_operand.hbm [shape: bf16[128,128], index: 1, kind: input, shape index: {}]   ;;  %s1379_s2 = inlined_call_operand.vmem [shape: f32[1,128], index: 2, kind: input, shape index: {}]   ;;  %s1380_s3 = inlined_call_operand.hbm [shape: bf16[128,128], index: 3, kind: input, shape index: {}]   ;;  %s1381_s4 = inlined_call_operand.vmem [shape: f32[1,128], index: 4, kind: input, shape index: {}]   ;;  %s1382_s5 = inlined_call_operand.hbm [shape: f32[32,128], index: 5, kind: output, shape index: {}]  }
   0x1   :  { %12 = vsyncpa [#allocation4 + $0x1], 0 }
   0x2   :  { %13 = vsyncpa [#allocation7], 0 }
   0x3   :  { %14 = vsyncpa [#allocation5], 0 }
   0x4   :  { %16 = vsyncpa [#allocation5 + $0x1], 0  ;;  %s1103_s18 = smov 0   ;;  %s1105_s19 = smov 0  }
   0x5   :  { %s1107_s20 = smov 0   ;;  %s1109_s21 = smov 0  }
   0x6   :  { %s1111_s22 = smov 0   ;;  %s1113_s23 = smov 0  }
   0x7 LB: > { %s684_s24 = sadd.s32 4294967295, %s1061_s23   ;;  %s685_s25 = sadd.s32 4294967294, %s1061_s23   ;;  %s1061_s23 = sphi %s1113_s23, %s22_s23   ;;  %s1057_s22 = sphi %s1111_s22, %s1406_s22   ;;  %s1053_s21 = sphi %s1109_s21, %s1405_s21   ;;  %s1049_s20 = sphi %s1107_s20, %s1404_s20   ;;  %s1045_s19 = sphi %s1105_s19, %s1403_s19   ;;  %s1041_s18 = sphi %s1103_s18, %s1402_s18  }
   0x8   : > { %p54_p0 = scmp.ne.s32.totalorder %s1045_s19, %s1041_s18  ;;  %p1137_p1 = scmp.eq.s32.totalorder %s684_s24, 0 }
   0x9   : > { %p1141_p2 = scmp.eq.s32.totalorder %s684_s24, 1  ;;  %p180_p3 = scmp.eq.s32.totalorder %s685_s25, 1 }
   0xa   : > { %s1388_s26 = scalar_select %p1137_p1, 1, 0 }
   0xb   : > { %p1147_p4 = por %p1137_p1, %p54_p0  ;;  %p686_p5 = scmp.ge.s32.totalorder %s1061_s23, 1 }
   0xc   : > { %p1152_p6 = por %p180_p3, %p54_p0  ;;  %p187_p7 = scmp.lt.s32.totalorder %s1061_s23, 3 }
   0xd   : > { %s1390_s28 = scalar_select %p1147_p4, 1, 0 }
   0xe   : > { %s1391_s29 = scalar_select %p1152_p6, 1, 0 }
   0xf   : > { %p1157_p8 = pnand %p686_p5, %p187_p7  ;;  %s1063_s6 = smov [#allocation6]  }
  0x10   : > { %s199_s7 = sshll.u32 %s1063_s6, 4  ;;  %s1064_s9 = smov [#allocation8]   ;;  %s1161_s7 = int_to_ptr.vmem [resolvable:$true] %s199_s7 }
  0x11   : > { %p795_p9 = pneg %p1157_p8  ;;  %s217_s10 = sshll.u32 %s1064_s9, 4  ;;  %s1172_s10 = int_to_ptr.vmem [resolvable:$true] %s217_s10 }
  0x12   : > { %s889_s13 = scalar_lea.hbm %s1378_s1, 1024 }
  0x13   : > { %p1168_p11 = pnand %p795_p9, %p1137_p1  ;;  %p890_p12 = scmp.ne.s32.totalorder %s1378_s1, %s889_s13 }
  0x14   : > { %p896_p5 = scmp.lt.u32.totalorder %s889_s13, %s1378_s1 }
  0x15   : > { %p891_p13 = pneg %p1168_p11 }
  0x17   : > { %p892_p0 = pnand %p891_p13, %p890_p12 }
  0x19   : > { %p893_p3 = pneg %p892_p0 }
  0x1b   : > { %p898_p7 = pnand %p896_p5, %p893_p3 }
  0x1d   : > { %901 = shalt.err (!%p898_p7)
}
  0x1e   : > { %s902_s24 = scalar_lea.vmem %s1161_s7, 1024  ;;  %p910_p1 = scmp.lt.s32.totalorder %s1161_s7, %s1161_s7 }
  0x1f   : > { %p903_p9 = scmp.ne.s32.totalorder %s1161_s7, %s902_s24  ;;  %p911_p12 = scmp.lt.s32.totalorder %s902_s24, %s902_s24 }
  0x21   : > { %p905_p10 = pnand %p903_p9, %p891_p13  ;;  %p912_p0 = por %p911_p12, %p910_p1 }
  0x23   : > { %p906_p6 = pneg %p905_p10 }
  0x25   : > { %p913_p4 = pnand %p912_p0, %p906_p6 }
  0x27   : > { %916 = shalt.err (!%p913_p4)
}
  0x28   : > { %s1386_s25 = smov 64   ;;  %s1066_s6 = smov 4  }
  0x29   : > { %798 = dma.hbm_to_vmem [thread:$0]  (!%p1168_p11), %s1378_s1, 1024, %s1161_s7, [#allocation7], %s1386_s25, %s1386_s25, %s1066_s6  }
  0x2a   : > { %s917_s14 = scalar_lea.hbm %s1380_s3, 1024 }
  0x2b   : > { %p918_p1 = scmp.ne.s32.totalorder %s1380_s3, %s917_s14  ;;  %p924_p10 = scmp.lt.u32.totalorder %s917_s14, %s1380_s3 }
  0x2d   : > { %p920_p4 = pnand %p918_p1, %p891_p13 }
  0x2f   : > { %p921_p6 = pneg %p920_p4 }
  0x31   : > { %p926_p3 = pnand %p924_p10, %p921_p6 }
  0x33   : > { %929 = shalt.err (!%p926_p3)
}
  0x34   : > { %s930_s7 = scalar_lea.vmem %s1172_s10, 1024  ;;  %p938_p12 = scmp.lt.s32.totalorder %s1172_s10, %s1172_s10 }
  0x35   : > { %p931_p5 = scmp.ne.s32.totalorder %s1172_s10, %s930_s7  ;;  %p939_p0 = scmp.lt.s32.totalorder %s930_s7, %s930_s7 }
  0x37   : > { %p933_p7 = pnand %p931_p5, %p891_p13  ;;  %p940_p1 = por %p939_p0, %p938_p12 }
  0x39   : > { %p934_p9 = pneg %p933_p7 }
  0x3b   : > { %p941_p4 = pnand %p940_p1, %p934_p9 }
  0x3d   : > { %944 = shalt.err (!%p941_p4)
}
  0x3e   : > { %801 = dma.hbm_to_vmem [thread:$0]  (!%p1168_p11), %s1380_s3, 1024, %s1172_s10, [#allocation7], %s1386_s25, %s1386_s25, %s1066_s6  }
  0x3f   : > { %s34_s8 = sadd.s32 1, %s1057_s22  ;;  %s41_s12 = sadd.s32 1, %s1049_s20 }
  0x40   : > { %p36_p13 = scmp.ge.s32.totalorder %s34_s8, 2  ;;  %p48_p6 = scmp.ne.s32.totalorder %s1049_s20, %s1045_s19 }
  0x41   : > { %p49_p10 = scmp.eq.s32.totalorder %s1061_s23, 0  ;;  %p812_p3 = scmp.lt.s32.totalorder %s1061_s23, 2 }
  0x42   : > { %s1408_s8 = smov (%p36_p13, %s34_s8), 0  ;;  %p1242_p7 = por %p1141_p2, %p48_p6 }
  0x43   : > { %p50_p5 = por %p49_p10, %p48_p6  ;;  %s38_s14 = ssub.s32 %s1057_s22, %s1408_s8 }
  0x44   : > { %s1394_s13 = scalar_select %p1242_p7, 1, 0 }
  0x45   : > { %s237_s15 = sand.u32 1, %s1049_s20   ;;  %p39_p9 = scmp.eq.s32.totalorder %s38_s14, 0 }
  0x46   : > { %s691_s10 = sshll.u32 %s237_s15, 3  ;;  %s723_s16 = sshll.u32 %s1057_s22, 7 }
  0x47   : > { %s1251_s17 = scalar_select %p39_p9, %s1049_s20, %s41_s12  }
  0x48   : > { %s1256_s9 = scalar_lea.hbm %s1377_s0, %s723_s16  ;;  %s241_s27 = scalar_lea.vmem [#allocation3], %s691_s10 }
  0x49   : > { %s248_s11 = sshll.u32 %s241_s27, 4  ;;  %p1260_p2 = pnand %p812_p3, %p50_p5  ;;  %s1264_s11 = int_to_ptr.vmem [resolvable:$true] %s248_s11 }
  0x4a   : > { %s1266_s12 = scalar_lea.sflag [#allocation4], %s237_s15  ;;  %s945_s14 = scalar_lea.hbm %s1256_s9, 128 }
  0x4b   : > { %p946_p11 = scmp.ne.s32.totalorder %s1256_s9, %s945_s14  ;;  %p947_p12 = pneg %p1260_p2 }
  0x4c   : > { %s950_s24 = scalar_lea.hbm %s1377_s0, 256  ;;  %p951_p4 = scmp.lt.u32.totalorder %s1256_s9, %s1377_s0 }
  0x4d   : > { %p948_p0 = pnand %p947_p12, %p946_p11  ;;  %p952_p13 = scmp.lt.u32.totalorder %s950_s24, %s945_s14 }
  0x4e   : > { %p954_p10 = scmp.lt.u32.totalorder %s945_s14, %s1256_s9 }
  0x4f   : > { %p949_p1 = pneg %p948_p0  ;;  %p953_p6 = por %p952_p13, %p951_p4 }
  0x51   : > { %p955_p3 = por %p954_p10, %p953_p6 }
  0x53   : > { %p956_p5 = pnand %p955_p3, %p949_p1 }
  0x55   : > { %959 = shalt.err (!%p956_p5)
}
  0x56   : > { %s960_s15 = scalar_lea.vmem %s1264_s11, 128  ;;  %s1067_s10 = smov [#allocation3]  }
  0x57   : > { %p961_p9 = scmp.ne.s32.totalorder %s1264_s11, %s960_s15  ;;  %s965_s16 = sshll.u32 %s1067_s10, 4  ;;  %s966_s16 = int_to_ptr.vmem [resolvable:$false] %s965_s16 }
  0x58   : > { %s967_s7 = scalar_lea.vmem %s966_s16, 256  ;;  %p968_p7 = scmp.lt.s32.totalorder %s1264_s11, %s966_s16 }
  0x59   : > { %p963_p11 = pnand %p961_p9, %p947_p12  ;;  %p969_p4 = scmp.lt.s32.totalorder %s967_s7, %s960_s15 }
  0x5b   : > { %p964_p0 = pneg %p963_p11  ;;  %p970_p13 = por %p969_p4, %p968_p7 }
  0x5d   : > { %p971_p6 = pnand %p970_p13, %p964_p0 }
  0x5f   : > { %974 = shalt.err (!%p971_p6)
}
  0x60   : > { %s1396_s14 = smov 64   ;;  %260 = sbr.rel (%p1157_p8) target bundleno = 592 (0x250), region = 40 }
  0x61   : > { %805 = dma.hbm_to_vmem [thread:$0]  (!%p1260_p2), %s1256_s9, 128, %s1264_s11, %s1266_s12, %s1396_s14, %s1396_s14, %s1066_s6  }
  0x62   : > { %s1300_s24 = sand.u32 (!%p1157_p8), 1, %s1045_s19   ;;  %p1397_p7 = scmp.ne.s32.totalorder (!%p1157_p8), %s1390_s28, 0 }
  0x63   : > { %s695_s27 = sshll.u32 (!%p1157_p8), %s1300_s24, 3  ;;  %s263_s15 = scalar_lea.sflag (!%p1157_p8), [#allocation4], %s1300_s24 }
  0x64   : > { %s1304_s10 = scalar_lea.vmem (!%p1157_p8), [#allocation3], %s695_s27 }
  0x67   : > { %1028 = dma.done.wait (%p1397_p7), %s263_s15, 128  }
  0x68   : > { %1030 = vsyncadd (%p1397_p7), %s263_s15, 4294967168  ;;  %p1398_p2 = scmp.ne.s32.totalorder %s1388_s26, 0 }
  0x6a   : > { %1032 = dma.done.wait (%p1398_p2), [#allocation7], 2048  }
  0x6b   : > { %1034 = vsyncadd (%p1398_p2), [#allocation7], 4294965248  ;;  %v1068_v0 = vmov 0.0   ;;  %vm1069_vm0 = vmmov 0   ;;  %v872_v1 = vld [vmem:[#allocation6] sm:$0xff]   ;;  %v873_v2 = vld [vmem:[#allocation6 + $0x8] sm:$0xff]  }
  0x6c   : > { %743 = vmatprep.subr.bf16.mxu0 %v1068_v0  ;;  %759 = vmatprep.mubr.msk.bf16.mxu0 %vm1069_vm0, %v1068_v0  ;;  %v874_v3 = vld [vmem:[#allocation6 + $0x10] sm:$0xff]   ;;  %v881_v4 = vld [vmem:[#allocation8] sm:$0xff]   ;;  %v875_v5 = vld [vmem:[#allocation6 + $0x18] sm:$0xff]   ;;  %s698_s30 = sshll.u32 %s1300_s24, 4  ;;  %s724_s12 = sshll.u32 %s1053_s21, 8 }
  0x6d   : > { %763 = vmatprep.subr.bf16.mxu1 %v1068_v0  ;;  %779 = vmatprep.mubr.msk.bf16.mxu1 %vm1069_vm0, %v1068_v0  ;;  %v882_v6 = vld [vmem:[#allocation8 + $0x8] sm:$0xff]   ;;  %v876_v7 = vld [vmem:[#allocation6 + $0x20] sm:$0xff]   ;;  %v883_v8 = vld [vmem:[#allocation8 + $0x10] sm:$0xff]   ;;  %s303_s9 = scalar_lea.vmem [#allocation9], %s698_s30  ;;  %s1328_s14 = scalar_lea.hbm %s1382_s5, %s724_s12 }
  0x6e   : > { %744 = vmatpush3.bf16.msra.mxu0 %v872_v1  ;;  %764 = vmatpush3.bf16.msra.mxu1 %v881_v4  ;;  %v877_v9 = vld [vmem:[#allocation6 + $0x28] sm:$0xff]   ;;  %v884_v10 = vld [vmem:[#allocation8 + $0x18] sm:$0xff]   ;;  %v878_v11 = vld [vmem:[#allocation6 + $0x30] sm:$0xff]   ;;  %s568_s11 = sshll.u32 %s303_s9, 4  ;;  %s554_s27 = scalar_lea.sflag [#allocation5], %s1300_s24  ;;  %s1323_s11 = int_to_ptr.vmem [resolvable:$true] %s568_s11 }
  0x6f   : > { %745 = vmatprep.subr.bf16.mxu0 %v1068_v0  ;;  %765 = vmatprep.subr.bf16.mxu1 %v1068_v0  ;;  %v885_v12 = vld [vmem:[#allocation8 + $0x20] sm:$0xff]   ;;  %v879_v13 = vld [vmem:[#allocation6 + $0x38] sm:$0xff]   ;;  %v886_v14 = vld [vmem:[#allocation8 + $0x28] sm:$0xff]   ;;  %s975_s21 = scalar_lea.vmem %s1323_s11, 256  ;;  %p1399_p12 = scmp.ne.s32.totalorder %s1394_s13, 0 }
  0x70   : > { %v880_v15 = vld [vmem:[%s1304_s10] sm:$0xff]   ;;  %p976_p8 = scmp.ne.s32.totalorder %s1323_s11, %s975_s21  ;;  %s1070_s15 = smov [#allocation9]  }
  0x71   : > { %v887_v16 = vld [vmem:[#allocation8 + $0x30] sm:$0xff]   ;;  %v888_v17 = vld [vmem:[#allocation8 + $0x38] sm:$0xff]   ;;  %s979_s10 = sshll.u32 %s1070_s15, 4  ;;  %s980_s10 = int_to_ptr.vmem [resolvable:$false] %s979_s10 }
  0x72   : > { %746 = vmatpush3.bf16.msra.mxu0 %v873_v2  ;;  %766 = vmatpush3.bf16.msra.mxu1 %v882_v6  ;;  %v699_v18 = vld [vmem:[%s1379_s2] ss:$0 sm:$0xff]  ;;  %p977_p1 = pnand %p976_p8, %p1399_p12  ;;  %s981_s26 = scalar_lea.vmem %s980_s10, 512 }
  0x73   : > { %747 = vmatprep.subr.bf16.mxu0 %v1068_v0  ;;  %767 = vmatprep.subr.bf16.mxu1 %v1068_v0  ;;  %v709_v28 = vld [vmem:[%s1381_s4] ss:$0 sm:$0xff]  ;;  %p982_p3 = scmp.lt.s32.totalorder %s1323_s11, %s980_s10  ;;  %p983_p5 = scmp.lt.s32.totalorder %s981_s26, %s975_s21 }
  0x74   : > { %p978_p10 = pneg %p977_p1 }
  0x75   : > { %p984_p9 = por %p983_p5, %p982_p3 }
  0x76   : > { %748 = vmatpush3.bf16.msra.mxu0 %v874_v3  ;;  %768 = vmatpush3.bf16.msra.mxu1 %v883_v8 }
  0x77   : > { %749 = vmatprep.subr.bf16.mxu0 %v1068_v0  ;;  %769 = vmatprep.subr.bf16.mxu1 %v1068_v0  ;;  %p985_p11 = pnand %p984_p9, %p978_p10 }
  0x7a   : > { %750 = vmatpush3.bf16.msra.mxu0 %v875_v5  ;;  %770 = vmatpush3.bf16.msra.mxu1 %v884_v10 }
  0x7b   : > { %751 = vmatprep.subr.bf16.mxu0 %v1068_v0  ;;  %771 = vmatprep.subr.bf16.mxu1 %v1068_v0 }
  0x7e   : > { %752 = vmatpush3.bf16.msra.mxu0 %v876_v7  ;;  %772 = vmatpush3.bf16.msra.mxu1 %v885_v12 }
  0x7f   : > { %753 = vmatprep.subr.bf16.mxu0 %v1068_v0  ;;  %773 = vmatprep.subr.bf16.mxu1 %v1068_v0 }
  0x82   : > { %754 = vmatpush3.bf16.msra.mxu0 %v877_v9  ;;  %774 = vmatpush3.bf16.msra.mxu1 %v886_v14 }
  0x83   : > { %755 = vmatprep.subr.bf16.mxu0 %v1068_v0  ;;  %775 = vmatprep.subr.bf16.mxu1 %v1068_v0 }
  0x86   : > { %756 = vmatpush3.bf16.msra.mxu0 %v878_v11  ;;  %776 = vmatpush3.bf16.msra.mxu1 %v887_v16 }
  0x87   : > { %757 = vmatprep.subr.bf16.mxu0 %v1068_v0  ;;  %777 = vmatprep.subr.bf16.mxu1 %v1068_v0 }
  0x8a   : > { %758 = vmatpush3.bf16.msra.mxu0 %v879_v13  ;;  %778 = vmatpush3.bf16.msra.mxu1 %v888_v17 }
  0x8d   : > { %760 = vmatmul.mubr.bf16.vlgmr.msra.gmra.mrb[0].mxu0 %v880_v15 }
 0x160   : > { %v427_v19 = vpop.f32.mrb[0].mxu0 }
 0x161   : > { %v428_v20 = vadd.f32 %v699_v18, %v427_v19  ;;  %v761_v21 = vpop.f32.mrb[1].mxu0 }
 0x162   : > { %v430_v22 = vpop.f32.mrb[2].mxu0 }
 0x163   : > { %v431_v23 = vadd.f32 %v699_v18, %v430_v22  ;;  %v762_v24 = vpop.f32.mrb[3].mxu0  ;;  %v434_v25 = vmax.f32 %v428_v20, 0.0 }
 0x165   : > { %v435_v26 = vmax.f32 %v431_v23, 0.0 }
 0x167   : > { %v436_v27 = vpack.c.bf16 %v435_v26, %v434_v25 }
 0x169   : > { %780 = vmatmul.mubr.bf16.vlgmr.msra.gmra.mrb[0].mxu1 %v436_v27 }
 0x23c   : > { %v544_v29 = vpop.f32.mrb[0].mxu1 }
 0x23d   : > { %v545_v30 = vadd.f32 %v709_v28, %v544_v29  ;;  %v781_v31 = vpop.f32.mrb[1].mxu1 }
 0x23e   : > { %v547_v32 = vpop.f32.mrb[2].mxu1 }
 0x23f   : > { %551 = vst [vmem:[%s303_s9] sm:$0xff] %v545_v30  ;;  %v548_v33 = vadd.f32 %v709_v28, %v547_v32  ;;  %v782_v34 = vpop.f32.mrb[3].mxu1 }
 0x241   : > { %552 = vst [vmem:[%s303_s9 + $0x8] sm:$0xff] %v548_v33 }
 0x242   : > { %988 = shalt.err (!%p985_p11)
}
 0x243   : > { %s989_s28 = scalar_lea.hbm %s1328_s14, 256  ;;  %s993_s6 = scalar_lea.hbm %s1382_s5, 512 }
 0x244   : > { %p990_p0 = scmp.ne.s32.totalorder %s1328_s14, %s989_s28  ;;  %p994_p6 = scmp.lt.u32.totalorder %s1328_s14, %s1382_s5 }
 0x245   : > { %p995_p7 = scmp.lt.u32.totalorder %s993_s6, %s989_s28  ;;  %p997_p8 = scmp.lt.u32.totalorder %s989_s28, %s1328_s14 }
 0x246   : > { %p991_p4 = pnand %p990_p0, %p1399_p12 }
 0x247   : > { %p996_p2 = por %p995_p7, %p994_p6 }
 0x248   : > { %p992_p13 = pneg %p991_p4 }
 0x249   : > { %p998_p1 = por %p997_p8, %p996_p2 }
 0x24b   : > { %p999_p10 = pnand %p998_p1, %p992_p13 }
 0x24d   : > { %1002 = shalt.err (!%p999_p10)
}
 0x24e   : > { %s1071_s16 = smov 128   ;;  %s1072_s7 = smov 8  }
 0x24f   : > { %793 = dma.vmem_to_hbm [thread:$0]  (%p1399_p12), %s1323_s11, 256, %s1328_s14, %s554_s27, %s1071_s16, %s1071_s16, %s1072_s7  }
 0x250 PF: > { %s583_s21 = sand.u32 1, %s1041_s18   ;;  %p1400_p3 = scmp.ne.s32.totalorder %s1391_s29, 0 }
 0x251   : > { %p1401_p5 = scmp.ge.s32.totalorder %s1061_s23, 2  ;;  %s584_s15 = scalar_lea.sflag [#allocation5], %s583_s21 }
 0x253   : > { %p807_p9 = pnand %p1401_p5, %p1400_p3 }
 0x255   : > { %1036 = dma.done.wait (!%p807_p9), %s584_s15, 256  }
 0x256   : > { %1038 = vsyncadd (!%p807_p9), %s584_s15, 4294967040  ;;  %s22_s23 = sadd.s32 1, %s1061_s23   ;;  %s1402_s18 = smov %s1045_s19 }
 0x257   : > { %p19_p11 = scmp.ge.s32.totalorder %s22_s23, 4   ;;  %s1403_s19 = smov %s1049_s20 }
 0x258   : > { %s1404_s20 = smov %s1251_s17  ;;  %s1405_s21 = smov %s1057_s22 }
 0x259   : > { %s1406_s22 = smov %s1408_s8  ;;  %21 = sbr.rel (!%p19_p11) target bundleno = 7 (0x7), region = 101 }
 0x260   :  { %589 = vsyncpa [#allocation4], 1 }
 0x261   :  { %591 = vsyncpa [#allocation4 + $0x1], 1 }
 0x262   :  { %592 = vsyncpa [#allocation7], 1 }
 0x263   :  { %593 = vsyncpa [#allocation5], 1 }
 0x264   :  { %595 = vsyncpa [#allocation5 + $0x1], 1 }

// kernel: tpu_custom_call.1
= control target key start
LH: loop header
LB: loop body
LE: loop exit
PB: predicated region body
PF: predicated region fallthrough
CT: control target
= control target key end

     0   :  { %10 = vsyncpa [#allocation4], 0  ;;  %s1377_s0 = inlined_call_operand.hbm [shape: bf16[32,128], index: 0, kind: input, shape index: {}]   ;;  %s1378_s1 = inlined_call_operand.hbm [shape: bf16[128,128], index: 1, kind: input, shape index: {}]   ;;  %s1379_s2 = inlined_call_operand.vmem [shape: f32[1,128], index: 2, kind: input, shape index: {}]   ;;  %s1380_s3 = inlined_call_operand.hbm [shape: bf16[128,128], index: 3, kind: input, shape index: {}]   ;;  %s1381_s4 = inlined_call_operand.vmem [shape: f32[1,128], index: 4, kind: input, shape index: {}]   ;;  %s1382_s5 = inlined_call_operand.hbm [shape: f32[32,128], index: 5, kind: output, shape index: {}]  }
   0x1   :  { %12 = vsyncpa [#allocation4 + $0x1], 0 }
   0x2   :  { %13 = vsyncpa [#allocation7], 0 }
   0x3   :  { %14 = vsyncpa [#allocation5], 0 }
   0x4   :  { %16 = vsyncpa [#allocation5 + $0x1], 0  ;;  %s1103_s18 = smov 0   ;;  %s1105_s19 = smov 0  }
   0x5   :  { %s1107_s20 = smov 0   ;;  %s1109_s21 = smov 0  }
   0x6   :  { %s1111_s22 = smov 0   ;;  %s1113_s23 = smov 0  }
   0x7 LB: > { %s684_s24 = sadd.s32 4294967295, %s1061_s23   ;;  %s685_s25 = sadd.s32 4294967294, %s1061_s23   ;;  %s1061_s23 = sphi %s1113_s23, %s22_s23   ;;  %s1057_s22 = sphi %s1111_s22, %s1406_s22   ;;  %s1053_s21 = sphi %s1109_s21, %s1405_s21   ;;  %s1049_s20 = sphi %s1107_s20, %s1404_s20   ;;  %s1045_s19 = sphi %s1105_s19, %s1403_s19   ;;  %s1041_s18 = sphi %s1103_s18, %s1402_s18  }
   0x8   : > { %p54_p0 = scmp.ne.s32.totalorder %s1045_s19, %s1041_s18  ;;  %p1137_p1 = scmp.eq.s32.totalorder %s684_s24, 0 }
   0x9   : > { %p1141_p2 = scmp.eq.s32.totalorder %s684_s24, 1  ;;  %p180_p3 = scmp.eq.s32.totalorder %s685_s25, 1 }
   0xa   : > { %s1388_s26 = scalar_select %p1137_p1, 1, 0 }
   0xb   : > { %p1147_p4 = por %p1137_p1, %p54_p0  ;;  %p686_p5 = scmp.ge.s32.totalorder %s1061_s23, 1 }
   0xc   : > { %p1152_p6 = por %p180_p3, %p54_p0  ;;  %p187_p7 = scmp.lt.s32.totalorder %s1061_s23, 3 }
   0xd   : > { %s1390_s28 = scalar_select %p1147_p4, 1, 0 }
   0xe   : > { %s1391_s29 = scalar_select %p1152_p6, 1, 0 }
   0xf   : > { %p1157_p8 = pnand %p686_p5, %p187_p7  ;;  %s1063_s6 = smov [#allocation6]  }
  0x10   : > { %s199_s7 = sshll.u32 %s1063_s6, 4  ;;  %s1064_s9 = smov [#allocation8]   ;;  %s1161_s7 = int_to_ptr.vmem [resolvable:$true] %s199_s7 }
  0x11   : > { %p795_p9 = pneg %p1157_p8  ;;  %s217_s10 = sshll.u32 %s1064_s9, 4  ;;  %s1172_s10 = int_to_ptr.vmem [resolvable:$true] %s217_s10 }
  0x12   : > { %s889_s13 = scalar_lea.hbm %s1378_s1, 1024 }
  0x13   : > { %p1168_p11 = pnand %p795_p9, %p1137_p1  ;;  %p890_p12 = scmp.ne.s32.totalorder %s1378_s1, %s889_s13 }
  0x14   : > { %p896_p5 = scmp.lt.u32.totalorder %s889_s13, %s1378_s1 }
  0x15   : > { %p891_p13 = pneg %p1168_p11 }
  0x17   : > { %p892_p0 = pnand %p891_p13, %p890_p12 }
  0x19   : > { %p893_p3 = pneg %p892_p0 }
  0x1b   : > { %p898_p7 = pnand %p896_p5, %p893_p3 }
  0x1d   : > { %901 = shalt.err (!%p898_p7)
}
  0x1e   : > { %s902_s24 = scalar_lea.vmem %s1161_s7, 1024  ;;  %p910_p1 = scmp.lt.s32.totalorder %s1161_s7, %s1161_s7 }
  0x1f   : > { %p903_p9 = scmp.ne.s32.totalorder %s1161_s7, %s902_s24  ;;  %p911_p12 = scmp.lt.s32.totalorder %s902_s24, %s902_s24 }
  0x21   : > { %p905_p10 = pnand %p903_p9, %p891_p13  ;;  %p912_p0 = por %p911_p12, %p910_p1 }
  0x23   : > { %p906_p6 = pneg %p905_p10 }
  0x25   : > { %p913_p4 = pnand %p912_p0, %p906_p6 }
  0x27   : > { %916 = shalt.err (!%p913_p4)
}
  0x28   : > { %s1386_s25 = smov 64   ;;  %s1066_s6 = smov 4  }
  0x29   : > { %798 = dma.hbm_to_vmem [thread:$0]  (!%p1168_p11), %s1378_s1, 1024, %s1161_s7, [#allocation7], %s1386_s25, %s1386_s25, %s1066_s6  }
  0x2a   : > { %s917_s14 = scalar_lea.hbm %s1380_s3, 1024 }
  0x2b   : > { %p918_p1 = scmp.ne.s32.totalorder %s1380_s3, %s917_s14  ;;  %p924_p10 = scmp.lt.u32.totalorder %s917_s14, %s1380_s3 }
  0x2d   : > { %p920_p4 = pnand %p918_p1, %p891_p13 }
  0x2f   : > { %p921_p6 = pneg %p920_p4 }
  0x31   : > { %p926_p3 = pnand %p924_p10, %p921_p6 }
  0x33   : > { %929 = shalt.err (!%p926_p3)
}
  0x34   : > { %s930_s7 = scalar_lea.vmem %s1172_s10, 1024  ;;  %p938_p12 = scmp.lt.s32.totalorder %s1172_s10, %s1172_s10 }
  0x35   : > { %p931_p5 = scmp.ne.s32.totalorder %s1172_s10, %s930_s7  ;;  %p939_p0 = scmp.lt.s32.totalorder %s930_s7, %s930_s7 }
  0x37   : > { %p933_p7 = pnand %p931_p5, %p891_p13  ;;  %p940_p1 = por %p939_p0, %p938_p12 }
  0x39   : > { %p934_p9 = pneg %p933_p7 }
  0x3b   : > { %p941_p4 = pnand %p940_p1, %p934_p9 }
  0x3d   : > { %944 = shalt.err (!%p941_p4)
}
  0x3e   : > { %801 = dma.hbm_to_vmem [thread:$0]  (!%p1168_p11), %s1380_s3, 1024, %s1172_s10, [#allocation7], %s1386_s25, %s1386_s25, %s1066_s6  }
  0x3f   : > { %s34_s8 = sadd.s32 1, %s1057_s22  ;;  %s41_s12 = sadd.s32 1, %s1049_s20 }
  0x40   : > { %p36_p13 = scmp.ge.s32.totalorder %s34_s8, 2  ;;  %p48_p6 = scmp.ne.s32.totalorder %s1049_s20, %s1045_s19 }
  0x41   : > { %p49_p10 = scmp.eq.s32.totalorder %s1061_s23, 0  ;;  %p812_p3 = scmp.lt.s32.totalorder %s1061_s23, 2 }
  0x42   : > { %s1408_s8 = smov (%p36_p13, %s34_s8), 0  ;;  %p1242_p7 = por %p1141_p2, %p48_p6 }
  0x43   : > { %p50_p5 = por %p49_p10, %p48_p6  ;;  %s38_s14 = ssub.s32 %s1057_s22, %s1408_s8 }
  0x44   : > { %s1394_s13 = scalar_select %p1242_p7, 1, 0 }
  0x45   : > { %s237_s15 = sand.u32 1, %s1049_s20   ;;  %p39_p9 = scmp.eq.s32.totalorder %s38_s14, 0 }
  0x46   : > { %s691_s10 = sshll.u32 %s237_s15, 3  ;;  %s723_s16 = sshll.u32 %s1057_s22, 7 }
  0x47   : > { %s1251_s17 = scalar_select %p39_p9, %s1049_s20, %s41_s12  }
  0x48   : > { %s1256_s9 = scalar_lea.hbm %s1377_s0, %s723_s16  ;;  %s241_s27 = scalar_lea.vmem [#allocation3], %s691_s10 }
  0x49   : > { %s248_s11 = sshll.u32 %s241_s27, 4  ;;  %p1260_p2 = pnand %p812_p3, %p50_p5  ;;  %s1264_s11 = int_to_ptr.vmem [resolvable:$true] %s248_s11 }
  0x4a   : > { %s1266_s12 = scalar_lea.sflag [#allocation4], %s237_s15  ;;  %s945_s14 = scalar_lea.hbm %s1256_s9, 128 }
  0x4b   : > { %p946_p11 = scmp.ne.s32.totalorder %s1256_s9, %s945_s14  ;;  %p947_p12 = pneg %p1260_p2 }
  0x4c   : > { %s950_s24 = scalar_lea.hbm %s1377_s0, 256  ;;  %p951_p4 = scmp.lt.u32.totalorder %s1256_s9, %s1377_s0 }
  0x4d   : > { %p948_p0 = pnand %p947_p12, %p946_p11  ;;  %p952_p13 = scmp.lt.u32.totalorder %s950_s24, %s945_s14 }
  0x4e   : > { %p954_p10 = scmp.lt.u32.totalorder %s945_s14, %s1256_s9 }
  0x4f   : > { %p949_p1 = pneg %p948_p0  ;;  %p953_p6 = por %p952_p13, %p951_p4 }
  0x51   : > { %p955_p3 = por %p954_p10, %p953_p6 }
  0x53   : > { %p956_p5 = pnand %p955_p3, %p949_p1 }
  0x55   : > { %959 = shalt.err (!%p956_p5)
}
  0x56   : > { %s960_s15 = scalar_lea.vmem %s1264_s11, 128  ;;  %s1067_s10 = smov [#allocation3]  }
  0x57   : > { %p961_p9 = scmp.ne.s32.totalorder %s1264_s11, %s960_s15  ;;  %s965_s16 = sshll.u32 %s1067_s10, 4  ;;  %s966_s16 = int_to_ptr.vmem [resolvable:$false] %s965_s16 }
  0x58   : > { %s967_s7 = scalar_lea.vmem %s966_s16, 256  ;;  %p968_p7 = scmp.lt.s32.totalorder %s1264_s11, %s966_s16 }
  0x59   : > { %p963_p11 = pnand %p961_p9, %p947_p12  ;;  %p969_p4 = scmp.lt.s32.totalorder %s967_s7, %s960_s15 }
  0x5b   : > { %p964_p0 = pneg %p963_p11  ;;  %p970_p13 = por %p969_p4, %p968_p7 }
  0x5d   : > { %p971_p6 = pnand %p970_p13, %p964_p0 }
  0x5f   : > { %974 = shalt.err (!%p971_p6)
}
  0x60   : > { %s1396_s14 = smov 64   ;;  %260 = sbr.rel (%p1157_p8) target bundleno = 592 (0x250), region = 40 }
  0x61   : > { %805 = dma.hbm_to_vmem [thread:$0]  (!%p1260_p2), %s1256_s9, 128, %s1264_s11, %s1266_s12, %s1396_s14, %s1396_s14, %s1066_s6  }
  0x62   : > { %s1300_s24 = sand.u32 (!%p1157_p8), 1, %s1045_s19   ;;  %p1397_p7 = scmp.ne.s32.totalorder (!%p1157_p8), %s1390_s28, 0 }
  0x63   : > { %s695_s27 = sshll.u32 (!%p1157_p8), %s1300_s24, 3  ;;  %s263_s15 = scalar_lea.sflag (!%p1157_p8), [#allocation4], %s1300_s24 }
  0x64   : > { %s1304_s10 = scalar_lea.vmem (!%p1157_p8), [#allocation3], %s695_s27 }
  0x67   : > { %1028 = dma.done.wait (%p1397_p7), %s263_s15, 128  }
  0x68   : > { %1030 = vsyncadd (%p1397_p7), %s263_s15, 4294967168  ;;  %p1398_p2 = scmp.ne.s32.totalorder %s1388_s26, 0 }
  0x6a   : > { %1032 = dma.done.wait (%p1398_p2), [#allocation7], 2048  }
  0x6b   : > { %1034 = vsyncadd (%p1398_p2), [#allocation7], 4294965248  ;;  %v1068_v0 = vmov 0.0   ;;  %vm1069_vm0 = vmmov 0   ;;  %v872_v1 = vld [vmem:[#allocation6] sm:$0xff]   ;;  %v873_v2 = vld [vmem:[#allocation6 + $0x8] sm:$0xff]  }
  0x6c   : > { %743 = vmatprep.subr.bf16.mxu0 %v1068_v0  ;;  %759 = vmatprep.mubr.msk.bf16.mxu0 %vm1069_vm0, %v1068_v0  ;;  %v874_v3 = vld [vmem:[#allocation6 + $0x10] sm:$0xff]   ;;  %v881_v4 = vld [vmem:[#allocation8] sm:$0xff]   ;;  %v875_v5 = vld [vmem:[#allocation6 + $0x18] sm:$0xff]   ;;  %s698_s30 = sshll.u32 %s1300_s24, 4  ;;  %s724_s12 = sshll.u32 %s1053_s21, 8 }
  0x6d   : > { %763 = vmatprep.subr.bf16.mxu1 %v1068_v0  ;;  %779 = vmatprep.mubr.msk.bf16.mxu1 %vm1069_vm0, %v1068_v0  ;;  %v882_v6 = vld [vmem:[#allocation8 + $0x8] sm:$0xff]   ;;  %v876_v7 = vld [vmem:[#allocation6 + $0x20] sm:$0xff]   ;;  %v883_v8 = vld [vmem:[#allocation8 + $0x10] sm:$0xff]   ;;  %s303_s9 = scalar_lea.vmem [#allocation9], %s698_s30  ;;  %s1328_s14 = scalar_lea.hbm %s1382_s5, %s724_s12 }
  0x6e   : > { %744 = vmatpush3.bf16.msra.mxu0 %v872_v1  ;;  %764 = vmatpush3.bf16.msra.mxu1 %v881_v4  ;;  %v877_v9 = vld [vmem:[#allocation6 + $0x28] sm:$0xff]   ;;  %v884_v10 = vld [vmem:[#allocation8 + $0x18] sm:$0xff]   ;;  %v878_v11 = vld [vmem:[#allocation6 + $0x30] sm:$0xff]   ;;  %s568_s11 = sshll.u32 %s303_s9, 4  ;;  %s554_s27 = scalar_lea.sflag [#allocation5], %s1300_s24  ;;  %s1323_s11 = int_to_ptr.vmem [resolvable:$true] %s568_s11 }
  0x6f   : > { %745 = vmatprep.subr.bf16.mxu0 %v1068_v0  ;;  %765 = vmatprep.subr.bf16.mxu1 %v1068_v0  ;;  %v885_v12 = vld [vmem:[#allocation8 + $0x20] sm:$0xff]   ;;  %v879_v13 = vld [vmem:[#allocation6 + $0x38] sm:$0xff]   ;;  %v886_v14 = vld [vmem:[#allocation8 + $0x28] sm:$0xff]   ;;  %s975_s21 = scalar_lea.vmem %s1323_s11, 256  ;;  %p1399_p12 = scmp.ne.s32.totalorder %s1394_s13, 0 }
  0x70   : > { %v880_v15 = vld [vmem:[%s1304_s10] sm:$0xff]   ;;  %p976_p8 = scmp.ne.s32.totalorder %s1323_s11, %s975_s21  ;;  %s1070_s15 = smov [#allocation9]  }
  0x71   : > { %v887_v16 = vld [vmem:[#allocation8 + $0x30] sm:$0xff]   ;;  %v888_v17 = vld [vmem:[#allocation8 + $0x38] sm:$0xff]   ;;  %s979_s10 = sshll.u32 %s1070_s15, 4  ;;  %s980_s10 = int_to_ptr.vmem [resolvable:$false] %s979_s10 }
  0x72   : > { %746 = vmatpush3.bf16.msra.mxu0 %v873_v2  ;;  %766 = vmatpush3.bf16.msra.mxu1 %v882_v6  ;;  %v699_v18 = vld [vmem:[%s1379_s2] ss:$0 sm:$0xff]  ;;  %p977_p1 = pnand %p976_p8, %p1399_p12  ;;  %s981_s26 = scalar_lea.vmem %s980_s10, 512 }
  0x73   : > { %747 = vmatprep.subr.bf16.mxu0 %v1068_v0  ;;  %767 = vmatprep.subr.bf16.mxu1 %v1068_v0  ;;  %v709_v28 = vld [vmem:[%s1381_s4] ss:$0 sm:$0xff]  ;;  %p982_p3 = scmp.lt.s32.totalorder %s1323_s11, %s980_s10  ;;  %p983_p5 = scmp.lt.s32.totalorder %s981_s26, %s975_s21 }
  0x74   : > { %p978_p10 = pneg %p977_p1 }
  0x75   : > { %p984_p9 = por %p983_p5, %p982_p3 }
  0x76   : > { %748 = vmatpush3.bf16.msra.mxu0 %v874_v3  ;;  %768 = vmatpush3.bf16.msra.mxu1 %v883_v8 }
  0x77   : > { %749 = vmatprep.subr.bf16.mxu0 %v1068_v0  ;;  %769 = vmatprep.subr.bf16.mxu1 %v1068_v0  ;;  %p985_p11 = pnand %p984_p9, %p978_p10 }
  0x7a   : > { %750 = vmatpush3.bf16.msra.mxu0 %v875_v5  ;;  %770 = vmatpush3.bf16.msra.mxu1 %v884_v10 }
  0x7b   : > { %751 = vmatprep.subr.bf16.mxu0 %v1068_v0  ;;  %771 = vmatprep.subr.bf16.mxu1 %v1068_v0 }
  0x7e   : > { %752 = vmatpush3.bf16.msra.mxu0 %v876_v7  ;;  %772 = vmatpush3.bf16.msra.mxu1 %v885_v12 }
  0x7f   : > { %753 = vmatprep.subr.bf16.mxu0 %v1068_v0  ;;  %773 = vmatprep.subr.bf16.mxu1 %v1068_v0 }
  0x82   : > { %754 = vmatpush3.bf16.msra.mxu0 %v877_v9  ;;  %774 = vmatpush3.bf16.msra.mxu1 %v886_v14 }
  0x83   : > { %755 = vmatprep.subr.bf16.mxu0 %v1068_v0  ;;  %775 = vmatprep.subr.bf16.mxu1 %v1068_v0 }
  0x86   : > { %756 = vmatpush3.bf16.msra.mxu0 %v878_v11  ;;  %776 = vmatpush3.bf16.msra.mxu1 %v887_v16 }
  0x87   : > { %757 = vmatprep.subr.bf16.mxu0 %v1068_v0  ;;  %777 = vmatprep.subr.bf16.mxu1 %v1068_v0 }
  0x8a   : > { %758 = vmatpush3.bf16.msra.mxu0 %v879_v13  ;;  %778 = vmatpush3.bf16.msra.mxu1 %v888_v17 }
  0x8d   : > { %760 = vmatmul.mubr.bf16.vlgmr.msra.gmra.mrb[0].mxu0 %v880_v15 }
 0x160   : > { %v427_v19 = vpop.f32.mrb[0].mxu0 }
 0x161   : > { %v428_v20 = vadd.f32 %v699_v18, %v427_v19  ;;  %v761_v21 = vpop.f32.mrb[1].mxu0 }
 0x162   : > { %v430_v22 = vpop.f32.mrb[2].mxu0 }
 0x163   : > { %v431_v23 = vadd.f32 %v699_v18, %v430_v22  ;;  %v762_v24 = vpop.f32.mrb[3].mxu0  ;;  %v434_v25 = vmax.f32 %v428_v20, 0.0 }
 0x165   : > { %v435_v26 = vmax.f32 %v431_v23, 0.0 }
 0x167   : > { %v436_v27 = vpack.c.bf16 %v435_v26, %v434_v25 }
 0x169   : > { %780 = vmatmul.mubr.bf16.vlgmr.msra.gmra.mrb[0].mxu1 %v436_v27 }
 0x23c   : > { %v544_v29 = vpop.f32.mrb[0].mxu1 }
 0x23d   : > { %v545_v30 = vadd.f32 %v709_v28, %v544_v29  ;;  %v781_v31 = vpop.f32.mrb[1].mxu1 }
 0x23e   : > { %v547_v32 = vpop.f32.mrb[2].mxu1 }
 0x23f   : > { %551 = vst [vmem:[%s303_s9] sm:$0xff] %v545_v30  ;;  %v548_v33 = vadd.f32 %v709_v28, %v547_v32  ;;  %v782_v34 = vpop.f32.mrb[3].mxu1 }
 0x241   : > { %552 = vst [vmem:[%s303_s9 + $0x8] sm:$0xff] %v548_v33 }
 0x242   : > { %988 = shalt.err (!%p985_p11)
}
 0x243   : > { %s989_s28 = scalar_lea.hbm %s1328_s14, 256  ;;  %s993_s6 = scalar_lea.hbm %s1382_s5, 512 }
 0x244   : > { %p990_p0 = scmp.ne.s32.totalorder %s1328_s14, %s989_s28  ;;  %p994_p6 = scmp.lt.u32.totalorder %s1328_s14, %s1382_s5 }
 0x245   : > { %p995_p7 = scmp.lt.u32.totalorder %s993_s6, %s989_s28  ;;  %p997_p8 = scmp.lt.u32.totalorder %s989_s28, %s1328_s14 }
 0x246   : > { %p991_p4 = pnand %p990_p0, %p1399_p12 }
 0x247   : > { %p996_p2 = por %p995_p7, %p994_p6 }
 0x248   : > { %p992_p13 = pneg %p991_p4 }
 0x249   : > { %p998_p1 = por %p997_p8, %p996_p2 }
 0x24b   : > { %p999_p10 = pnand %p998_p1, %p992_p13 }
 0x24d   : > { %1002 = shalt.err (!%p999_p10)
}
 0x24e   : > { %s1071_s16 = smov 128   ;;  %s1072_s7 = smov 8  }
 0x24f   : > { %793 = dma.vmem_to_hbm [thread:$0]  (%p1399_p12), %s1323_s11, 256, %s1328_s14, %s554_s27, %s1071_s16, %s1071_s16, %s1072_s7  }
 0x250 PF: > { %s583_s21 = sand.u32 1, %s1041_s18   ;;  %p1400_p3 = scmp.ne.s32.totalorder %s1391_s29, 0 }
 0x251   : > { %p1401_p5 = scmp.ge.s32.totalorder %s1061_s23, 2  ;;  %s584_s15 = scalar_lea.sflag [#allocation5], %s583_s21 }
 0x253   : > { %p807_p9 = pnand %p1401_p5, %p1400_p3 }
 0x255   : > { %1036 = dma.done.wait (!%p807_p9), %s584_s15, 256  }
 0x256   : > { %1038 = vsyncadd (!%p807_p9), %s584_s15, 4294967040  ;;  %s22_s23 = sadd.s32 1, %s1061_s23   ;;  %s1402_s18 = smov %s1045_s19 }
 0x257   : > { %p19_p11 = scmp.ge.s32.totalorder %s22_s23, 4   ;;  %s1403_s19 = smov %s1049_s20 }
 0x258   : > { %s1404_s20 = smov %s1251_s17  ;;  %s1405_s21 = smov %s1057_s22 }
 0x259   : > { %s1406_s22 = smov %s1408_s8  ;;  %21 = sbr.rel (!%p19_p11) target bundleno = 7 (0x7), region = 101 }
 0x260   :  { %589 = vsyncpa [#allocation4], 1 }
 0x261   :  { %591 = vsyncpa [#allocation4 + $0x1], 1 }
 0x262   :  { %592 = vsyncpa [#allocation7], 1 }
 0x263   :  { %593 = vsyncpa [#allocation5], 1 }
 0x264   :  { %595 = vsyncpa [#allocation5 + $0x1], 1 }

</bundles_post_ra>
